<compile_context>
chip_gen: v7x
topology: tpu7x:2x2x1
jax: 0.10.0
libtpu: 0.0.40
codegen_flags: <defaults>
</compile_context>

<pallas_src>
import math
import functools

import jax
import jax.numpy as jnp
from jax.experimental import pallas as pl
from jax.experimental.pallas import tpu as pltpu


def _encoder_layer_kernel(xq_ref, xkv_ref,
                          wq_ref, bq_ref, wkv_ref, bkv_ref,
                          wo_ref, bo_ref, w1_ref, b1_ref, w2_ref, b2_ref,
                          g1_ref, be1_ref, g2_ref, be2_ref,
                          o_ref, attn_ref, *, d_model, nhead, eps):
    head_dim = d_model // nhead

    xq = xq_ref[0].astype(jnp.float32)            # (TQ, D) query rows (and residual input)
    xq_b = xq.astype(jnp.bfloat16)
    xkv_b = xkv_ref[0].astype(jnp.bfloat16)       # (S, D)  full sequence (K/V source)

    # ---- projections (bf16 inputs, f32 accumulation on the MXU) ----
    # Q scale (1/sqrt(head_dim)) is already folded into wq/bq by the wrapper.
    q = jnp.dot(xq_b, wq_ref[...], preferred_element_type=jnp.float32) + bq_ref[...]
    kv = jnp.dot(xkv_b, wkv_ref[...], preferred_element_type=jnp.float32) + bkv_ref[...]
    k = kv[:, :d_model]
    v = kv[:, d_model:]

    q_b = q.astype(jnp.bfloat16)
    k_b = k.astype(jnp.bfloat16)
    v_b = v.astype(jnp.bfloat16)

    # ---- per-head softmax(QK^T)V, written directly into the VMEM attn scratch ----
    # TODO(synk): for very long S, switch to online-softmax (flash) over key tiles and group
    # heads so MXU lane width is >=128 when head_dim is small.
    for h in range(nhead):
        lo, hi = h * head_dim, (h + 1) * head_dim
        s = jax.lax.dot_general(q_b[:, lo:hi], k_b[:, lo:hi],
                                dimension_numbers=(((1,), (1,)), ((), ())),
                                preferred_element_type=jnp.float32)        # (TQ, S)
        s = s - jnp.max(s, axis=-1, keepdims=True)
        p = jnp.exp(s)
        p = p * pl.reciprocal(jnp.sum(p, axis=-1, keepdims=True), approx=True)
        attn_ref[:, lo:hi] = jnp.dot(p.astype(jnp.bfloat16), v_b[:, lo:hi],
                                     preferred_element_type=jnp.float32)

    attn = jnp.dot(attn_ref[...].astype(jnp.bfloat16), wo_ref[...],
                   preferred_element_type=jnp.float32) + bo_ref[...]

    # ---- residual + LayerNorm1 (f32) ----
    y = xq + attn
    mu = jnp.mean(y, axis=-1, keepdims=True)
    var = jnp.mean((y - mu) * (y - mu), axis=-1, keepdims=True)
    y = (y - mu) * jax.lax.rsqrt(var + eps) * g1_ref[...] + be1_ref[...]

    # ---- feed-forward (NOTE: the reference module applies NO activation) ----
    h1 = jnp.dot(y.astype(jnp.bfloat16), w1_ref[...],
                 preferred_element_type=jnp.float32) + b1_ref[...]
    h2 = jnp.dot(h1.astype(jnp.bfloat16), w2_ref[...],
                 preferred_element_type=jnp.float32) + b2_ref[...]

    # ---- residual + LayerNorm2 (f32) ----
    z = y + h2
    mu2 = jnp.mean(z, axis=-1, keepdims=True)
    var2 = jnp.mean((z - mu2) * (z - mu2), axis=-1, keepdims=True)
    z = (z - mu2) * jax.lax.rsqrt(var2 + eps) * g2_ref[...] + be2_ref[...]

    o_ref[0] = z.astype(o_ref.dtype)


def _pick_query_tile(S):
    for t in (256, 128, 64, 32, 16, 8):
        if S % t == 0:
            return t
    return S  # irregular/tiny S: one tile equal to the full sequence dim


def _vmem_limit_bytes(S, TQ, D, F):
    bf16, f32 = 2, 4
    weights = bf16 * (D * D + D * 2 * D + D * D + D * F + F * D)     # resident, single copy
    vectors = f32 * (D + 2 * D + D + F + D + 4 * D)                  # biases + LN params
    blocks = 2 * f32 * (TQ * D + S * D + TQ * D)                     # double-buffered x_q/x_kv/out
    scratch = f32 * TQ * D
    live = f32 * (TQ * 3 * D + S * 3 * D + TQ * S + TQ * F + 6 * TQ * D)
    est = weights + vectors + blocks + scratch + live
    return int(min(max(2 * est, 32 * 1024 * 1024), 64 * 1024 * 1024))


def transformer_encoder_layer(src, params, *, nhead, eps=1e-5, batch_first=False):
    """src: (S, B, D) float32 (PyTorch layout) or (B, S, D) if batch_first=True."""
    if batch_first:
        x_bsd = src
        B, S, D = src.shape
    else:
        S, B, D = src.shape
        x_bsd = jnp.transpose(src, (1, 0, 2))
    F = params["w1"].shape[0]
    head_dim = D // nhead
    scale = 1.0 / math.sqrt(head_dim)

    wqkv, bqkv = params["wqkv"], params["bqkv"]
    # One-time weight transforms: fold the Q scale, pre-transpose so the kernel never
    # transposes, cast the big matrices to bf16 (matmuls still accumulate in f32).
    wq_t = (wqkv[:D] * scale).T.astype(jnp.bfloat16)                 # (D, D)
    bq = (bqkv[:D] * scale).reshape(1, D)
    wkv_t = wqkv[D:].T.astype(jnp.bfloat16)                          # (D, 2D)
    bkv = bqkv[D:].reshape(1, 2 * D)
    wo_t = params["wo"].T.astype(jnp.bfloat16)                       # (D, D)
    bo = params["bo"].reshape(1, D)
    w1_t = params["w1"].T.astype(jnp.bfloat16)                       # (D, F)
    b1 = params["b1"].reshape(1, F)
    w2_t = params["w2"].T.astype(jnp.bfloat16)                       # (F, D)
    b2 = params["b2"].reshape(1, D)
    g1 = params["g1"].reshape(1, D)
    be1 = params["be1"].reshape(1, D)
    g2 = params["g2"].reshape(1, D)
    be2 = params["be2"].reshape(1, D)

    TQ = _pick_query_tile(S)
    NQ = S // TQ if S % TQ == 0 else 1

    kernel = functools.partial(_encoder_layer_kernel, d_model=D, nhead=nhead, eps=eps)

    # Whole-array, single-buffered VMEM residency for weights / biases / LN params.
    vmem_spec = pl.BlockSpec(memory_space=pltpu.MemorySpace.VMEM)

    out_bsd = pl.pallas_call(
        kernel,
        out_shape=jax.ShapeDtypeStruct((B, S, D), src.dtype),
        grid_spec=pltpu.PrefetchScalarGridSpec(
            num_scalar_prefetch=0,
            grid=(B, NQ),
            in_specs=[
                pl.BlockSpec((1, TQ, D), lambda b, qi: (b, qi, 0)),   # query rows / residual
                pl.BlockSpec((1, S, D), lambda b, qi: (b, 0, 0)),     # full sequence for K/V
                vmem_spec, vmem_spec,                                 # wq_t, bq
                vmem_spec, vmem_spec,                                 # wkv_t, bkv
                vmem_spec, vmem_spec,                                 # wo_t, bo
                vmem_spec, vmem_spec,                                 # w1_t, b1
                vmem_spec, vmem_spec,                                 # w2_t, b2
                vmem_spec, vmem_spec, vmem_spec, vmem_spec,           # g1, be1, g2, be2
            ],
            out_specs=pl.BlockSpec((1, TQ, D), lambda b, qi: (b, qi, 0)),
            scratch_shapes=[pltpu.VMEM((TQ, D), jnp.float32)],        # attention output slab
        ),
        compiler_params=pltpu.CompilerParams(
            dimension_semantics=("parallel", "parallel"),
            vmem_limit_bytes=_vmem_limit_bytes(S, TQ, D, F),
        ),
    )(x_bsd, x_bsd,
      wq_t, bq, wkv_t, bkv, wo_t, bo, w1_t, b1, w2_t, b2, g1, be1, g2, be2)

    return out_bsd if batch_first else jnp.transpose(out_bsd, (1, 0, 2))


def _reference(src, params, *, nhead, eps=1e-5):
    """Pure-JAX f32 reference mirroring PyTorch eval-mode forward."""
    S, B, D = src.shape
    Dh = D // nhead
    scale = 1.0 / math.sqrt(Dh)
    x = src.astype(jnp.float32)

    qkv = jnp.einsum("sbd,ed->sbe", x, params["wqkv"]) + params["bqkv"]
    q, k, v = jnp.split(qkv, 3, axis=-1)

    def split_heads(t):  # (S,B,D) -> (B,H,S,Dh)
        return jnp.transpose(t.reshape(S, B, nhead, Dh), (1, 2, 0, 3))

    qh, kh, vh = split_heads(q) * scale, split_heads(k), split_heads(v)
    s = jnp.einsum("bhqd,bhkd->bhqk", qh, kh)
    p = jax.nn.softmax(s, axis=-1)
    o = jnp.einsum("bhqk,bhkd->bhqd", p, vh)
    o = jnp.transpose(o, (2, 0, 1, 3)).reshape(S, B, D)
    attn = jnp.einsum("sbd,ed->sbe", o, params["wo"]) + params["bo"]

    def ln(t, g, b):
        mu = jnp.mean(t, axis=-1, keepdims=True)
        var = jnp.mean((t - mu) ** 2, axis=-1, keepdims=True)
        return (t - mu) * jax.lax.rsqrt(var + eps) * g + b

    y = ln(x + attn, params["g1"], params["be1"])
    h1 = jnp.einsum("sbd,fd->sbf", y, params["w1"]) + params["b1"]
    h2 = jnp.einsum("sbf,df->sbd", h1, params["w2"]) + params["b2"]
    return ln(y + h2, params["g2"], params["be2"])


if __name__ == "__main__":
    S, B, D, H, F = 8, 2, 32, 4, 64   # seq, batch, d_model, nhead, dim_feedforward

    key = jax.random.PRNGKey(0)
    keys = jax.random.split(key, 12)
    params = {
        "wqkv": jax.random.normal(keys[0], (3 * D, D), jnp.float32) * 0.05,
        "bqkv": jax.random.normal(keys[1], (3 * D,), jnp.float32) * 0.02,
        "wo":   jax.random.normal(keys[2], (D, D), jnp.float32) * 0.05,
        "bo":   jax.random.normal(keys[3], (D,), jnp.float32) * 0.02,
        "w1":   jax.random.normal(keys[4], (F, D), jnp.float32) * 0.05,
        "b1":   jax.random.normal(keys[5], (F,), jnp.float32) * 0.02,
        "w2":   jax.random.normal(keys[6], (D, F), jnp.float32) * 0.05,
        "b2":   jax.random.normal(keys[7], (D,), jnp.float32) * 0.02,
        "g1":   1.0 + 0.1 * jax.random.normal(keys[8], (D,), jnp.float32),
        "be1":  0.1 * jax.random.normal(keys[9], (D,), jnp.float32),
        "g2":   1.0 + 0.1 * jax.random.normal(keys[10], (D,), jnp.float32),
        "be2":  0.1 * jax.random.normal(keys[11], (D,), jnp.float32),
    }

    src = jax.random.normal(jax.random.PRNGKey(42), (S, B, D), jnp.float32)

    out = transformer_encoder_layer(src, params, nhead=H)
    out = jax.block_until_ready(out)

    ref = _reference(src, params, nhead=H)
    assert out.shape == (S, B, D)
    # bf16 matmul operands with f32 accumulation vs. a pure-f32 reference.
    assert jnp.allclose(out, ref, rtol=2e-2, atol=2e-2), "mismatch vs reference"

    print("KERNEL_OK")
</pallas_src>

<mosaic_0001>
module attributes {stable_mosaic.version = 11 : i64} {
  func.func @_encoder_layer_kernel(%arg0: i32, %arg1: i32, %arg2: memref<1x8x32xf32, #tpu.memory_space<vmem>>, %arg3: memref<1x8x32xf32, #tpu.memory_space<vmem>>, %arg4: memref<32x32xbf16, #tpu.memory_space<vmem>>, %arg5: memref<1x32xf32, #tpu.memory_space<vmem>>, %arg6: memref<32x64xbf16, #tpu.memory_space<vmem>>, %arg7: memref<1x64xf32, #tpu.memory_space<vmem>>, %arg8: memref<32x32xbf16, #tpu.memory_space<vmem>>, %arg9: memref<1x32xf32, #tpu.memory_space<vmem>>, %arg10: memref<32x64xbf16, #tpu.memory_space<vmem>>, %arg11: memref<1x64xf32, #tpu.memory_space<vmem>>, %arg12: memref<64x32xbf16, #tpu.memory_space<vmem>>, %arg13: memref<1x32xf32, #tpu.memory_space<vmem>>, %arg14: memref<1x32xf32, #tpu.memory_space<vmem>>, %arg15: memref<1x32xf32, #tpu.memory_space<vmem>>, %arg16: memref<1x32xf32, #tpu.memory_space<vmem>>, %arg17: memref<1x32xf32, #tpu.memory_space<vmem>>, %arg18: memref<1x8x32xf32, #tpu.memory_space<vmem>>, %arg19: memref<8x32xf32, #tpu.memory_space<vmem>>) attributes {dimension_semantics = [#tpu.dimension_semantics<parallel>, #tpu.dimension_semantics<parallel>], iteration_bounds = array<i64: 2, 1>, scalar_prefetch = 0 : i64, scratch_operands = 1 : i64, tpu.core_type = #tpu.core_type<tc>, window_params = [{transform_indices = @transform_0, window_bounds = array<i64: 1, 8, 32>}, {transform_indices = @transform_1, window_bounds = array<i64: 1, 8, 32>}, {pipeline_mode = #tpu.pipeline_mode<synchronous>, transform_indices = @transform_2, window_bounds = array<i64: 32, 32>}, {pipeline_mode = #tpu.pipeline_mode<synchronous>, transform_indices = @transform_3, window_bounds = array<i64: 1, 32>}, {pipeline_mode = #tpu.pipeline_mode<synchronous>, transform_indices = @transform_4, window_bounds = array<i64: 32, 64>}, {pipeline_mode = #tpu.pipeline_mode<synchronous>, transform_indices = @transform_5, window_bounds = array<i64: 1, 64>}, {pipeline_mode = #tpu.pipeline_mode<synchronous>, transform_indices = @transform_6, window_bounds = array<i64: 32, 32>}, {pipeline_mode = #tpu.pipeline_mode<synchronous>, transform_indices = @transform_7, window_bounds = array<i64: 1, 32>}, {pipeline_mode = #tpu.pipeline_mode<synchronous>, transform_indices = @transform_8, window_bounds = array<i64: 32, 64>}, {pipeline_mode = #tpu.pipeline_mode<synchronous>, transform_indices = @transform_9, window_bounds = array<i64: 1, 64>}, {pipeline_mode = #tpu.pipeline_mode<synchronous>, transform_indices = @transform_10, window_bounds = array<i64: 64, 32>}, {pipeline_mode = #tpu.pipeline_mode<synchronous>, transform_indices = @transform_11, window_bounds = array<i64: 1, 32>}, {pipeline_mode = #tpu.pipeline_mode<synchronous>, transform_indices = @transform_12, window_bounds = array<i64: 1, 32>}, {pipeline_mode = #tpu.pipeline_mode<synchronous>, transform_indices = @transform_13, window_bounds = array<i64: 1, 32>}, {pipeline_mode = #tpu.pipeline_mode<synchronous>, transform_indices = @transform_14, window_bounds = array<i64: 1, 32>}, {pipeline_mode = #tpu.pipeline_mode<synchronous>, transform_indices = @transform_15, window_bounds = array<i64: 1, 32>}, {transform_indices = @transform_16, window_bounds = array<i64: 1, 8, 32>}]} {
    %c0 = arith.constant 0 : index
    %c0_0 = arith.constant 0 : index
    %c0_1 = arith.constant 0 : index
    %0 = vector.load %arg2[%c0, %c0_0, %c0_1] : memref<1x8x32xf32, #tpu.memory_space<vmem>>, vector<1x8x32xf32>
    %1 = vector.shape_cast %0 : vector<1x8x32xf32> to vector<8x32xf32>
    %2 = arith.truncf %1 : vector<8x32xf32> to vector<8x32xbf16>
    %c0_2 = arith.constant 0 : index
    %c0_3 = arith.constant 0 : index
    %c0_4 = arith.constant 0 : index
    %3 = vector.load %arg3[%c0_2, %c0_3, %c0_4] : memref<1x8x32xf32, #tpu.memory_space<vmem>>, vector<1x8x32xf32>
    %4 = vector.shape_cast %3 : vector<1x8x32xf32> to vector<8x32xf32>
    %5 = arith.truncf %4 : vector<8x32xf32> to vector<8x32xbf16>
    %c0_5 = arith.constant 0 : index
    %c0_6 = arith.constant 0 : index
    %6 = vector.load %arg4[%c0_5, %c0_6] : memref<32x32xbf16, #tpu.memory_space<vmem>>, vector<32x32xbf16>
    %cst = arith.constant dense<0.000000e+00> : vector<8x32xf32>
    %7 = tpu.matmul %2, %6, %cst {dimension_numbers = #tpu.dot_dimension_numbers<[1], [0], [0], [1], [0, 0, 1, 1], [], []>} : vector<8x32xbf16>, vector<32x32xbf16>, vector<8x32xf32> -> vector<8x32xf32>
    %c0_7 = arith.constant 0 : index
    %c0_8 = arith.constant 0 : index
    %8 = vector.load %arg5[%c0_7, %c0_8] : memref<1x32xf32, #tpu.memory_space<vmem>>, vector<1x32xf32>
    %9 = vector.broadcast %8 : vector<1x32xf32> to vector<8x32xf32>
    %10 = arith.addf %7, %9 : vector<8x32xf32>
    %c0_9 = arith.constant 0 : index
    %c0_10 = arith.constant 0 : index
    %11 = vector.load %arg6[%c0_9, %c0_10] : memref<32x64xbf16, #tpu.memory_space<vmem>>, vector<32x64xbf16>
    %cst_11 = arith.constant dense<0.000000e+00> : vector<8x64xf32>
    %12 = tpu.matmul %5, %11, %cst_11 {dimension_numbers = #tpu.dot_dimension_numbers<[1], [0], [0], [1], [0, 0, 1, 1], [], []>} : vector<8x32xbf16>, vector<32x64xbf16>, vector<8x64xf32> -> vector<8x64xf32>
    %c0_12 = arith.constant 0 : index
    %c0_13 = arith.constant 0 : index
    %13 = vector.load %arg7[%c0_12, %c0_13] : memref<1x64xf32, #tpu.memory_space<vmem>>, vector<1x64xf32>
    %14 = vector.broadcast %13 : vector<1x64xf32> to vector<8x64xf32>
    %15 = arith.addf %12, %14 : vector<8x64xf32>
    %16 = vector.extract_strided_slice %15 {offsets = [0, 0], sizes = [8, 32], strides = [1, 1]} : vector<8x64xf32> to vector<8x32xf32>
    %17 = vector.extract_strided_slice %15 {offsets = [0, 32], sizes = [8, 32], strides = [1, 1]} : vector<8x64xf32> to vector<8x32xf32>
    %18 = arith.truncf %10 : vector<8x32xf32> to vector<8x32xbf16>
    %19 = arith.truncf %16 : vector<8x32xf32> to vector<8x32xbf16>
    %20 = arith.truncf %17 : vector<8x32xf32> to vector<8x32xbf16>
    %21 = vector.extract_strided_slice %18 {offsets = [0, 0], sizes = [8, 8], strides = [1, 1]} : vector<8x32xbf16> to vector<8x8xbf16>
    %22 = vector.extract_strided_slice %19 {offsets = [0, 0], sizes = [8, 8], strides = [1, 1]} : vector<8x32xbf16> to vector<8x8xbf16>
    %cst_14 = arith.constant dense<0.000000e+00> : vector<8x8xf32>
    %23 = tpu.matmul %21, %22, %cst_14 {dimension_numbers = #tpu.dot_dimension_numbers<[1], [1], [0], [0], [0, 0, 1, 0], [], []>} : vector<8x8xbf16>, vector<8x8xbf16>, vector<8x8xf32> -> vector<8x8xf32>
    %cst_15 = arith.constant dense<0xFF800000> : vector<8xf32>
    %24 = vector.multi_reduction <maximumf>, %23, %cst_15 [1] : vector<8x8xf32> to vector<8xf32>
    %25 = vector.shape_cast %24 : vector<8xf32> to vector<8x1xf32>
    %26 = vector.broadcast %25 : vector<8x1xf32> to vector<8x8xf32>
    %27 = arith.subf %23, %26 : vector<8x8xf32>
    %28 = math.exp %27 : vector<8x8xf32>
    %cst_16 = arith.constant dense<0.000000e+00> : vector<8xf32>
    %29 = vector.multi_reduction <add>, %28, %cst_16 [1] : vector<8x8xf32> to vector<8xf32>
    %30 = vector.shape_cast %29 : vector<8xf32> to vector<8x1xf32>
    %31 = tpu.reciprocal %30 {approx = true} : vector<8x1xf32> -> vector<8x1xf32>
    %32 = vector.broadcast %31 : vector<8x1xf32> to vector<8x8xf32>
    %33 = arith.mulf %28, %32 : vector<8x8xf32>
    %34 = arith.truncf %33 : vector<8x8xf32> to vector<8x8xbf16>
    %35 = vector.extract_strided_slice %20 {offsets = [0, 0], sizes = [8, 8], strides = [1, 1]} : vector<8x32xbf16> to vector<8x8xbf16>
    %cst_17 = arith.constant dense<0.000000e+00> : vector<8x8xf32>
    %36 = tpu.matmul %34, %35, %cst_17 {dimension_numbers = #tpu.dot_dimension_numbers<[1], [0], [0], [1], [0, 0, 1, 1], [], []>} : vector<8x8xbf16>, vector<8x8xbf16>, vector<8x8xf32> -> vector<8x8xf32>
    %c0_18 = arith.constant 0 : index
    %c0_19 = arith.constant 0 : index
    %37 = vector.load %arg19[%c0_18, %c0_19] : memref<8x32xf32, #tpu.memory_space<vmem>>, vector<8x8xf32>
    tpu.vector_store %arg19[%c0_18, %c0_19], %36 {strides = array<i32>} : memref<8x32xf32, #tpu.memory_space<vmem>>, vector<8x8xf32>,
    %38 = vector.extract_strided_slice %18 {offsets = [0, 8], sizes = [8, 8], strides = [1, 1]} : vector<8x32xbf16> to vector<8x8xbf16>
    %39 = vector.extract_strided_slice %19 {offsets = [0, 8], sizes = [8, 8], strides = [1, 1]} : vector<8x32xbf16> to vector<8x8xbf16>
    %cst_20 = arith.constant dense<0.000000e+00> : vector<8x8xf32>
    %40 = tpu.matmul %38, %39, %cst_20 {dimension_numbers = #tpu.dot_dimension_numbers<[1], [1], [0], [0], [0, 0, 1, 0], [], []>} : vector<8x8xbf16>, vector<8x8xbf16>, vector<8x8xf32> -> vector<8x8xf32>
    %cst_21 = arith.constant dense<0xFF800000> : vector<8xf32>
    %41 = vector.multi_reduction <maximumf>, %40, %cst_21 [1] : vector<8x8xf32> to vector<8xf32>
    %42 = vector.shape_cast %41 : vector<8xf32> to vector<8x1xf32>
    %43 = vector.broadcast %42 : vector<8x1xf32> to vector<8x8xf32>
    %44 = arith.subf %40, %43 : vector<8x8xf32>
    %45 = math.exp %44 : vector<8x8xf32>
    %cst_22 = arith.constant dense<0.000000e+00> : vector<8xf32>
    %46 = vector.multi_reduction <add>, %45, %cst_22 [1] : vector<8x8xf32> to vector<8xf32>
    %47 = vector.shape_cast %46 : vector<8xf32> to vector<8x1xf32>
    %48 = tpu.reciprocal %47 {approx = true} : vector<8x1xf32> -> vector<8x1xf32>
    %49 = vector.broadcast %48 : vector<8x1xf32> to vector<8x8xf32>
    %50 = arith.mulf %45, %49 : vector<8x8xf32>
    %51 = arith.truncf %50 : vector<8x8xf32> to vector<8x8xbf16>
    %52 = vector.extract_strided_slice %20 {offsets = [0, 8], sizes = [8, 8], strides = [1, 1]} : vector<8x32xbf16> to vector<8x8xbf16>
    %cst_23 = arith.constant dense<0.000000e+00> : vector<8x8xf32>
    %53 = tpu.matmul %51, %52, %cst_23 {dimension_numbers = #tpu.dot_dimension_numbers<[1], [0], [0], [1], [0, 0, 1, 1], [], []>} : vector<8x8xbf16>, vector<8x8xbf16>, vector<8x8xf32> -> vector<8x8xf32>
    %c0_24 = arith.constant 0 : index
    %c8 = arith.constant 8 : index
    %54 = vector.load %arg19[%c0_24, %c8] : memref<8x32xf32, #tpu.memory_space<vmem>>, vector<8x8xf32>
    tpu.vector_store %arg19[%c0_24, %c8], %53 {strides = array<i32>} : memref<8x32xf32, #tpu.memory_space<vmem>>, vector<8x8xf32>,
    %55 = vector.extract_strided_slice %18 {offsets = [0, 16], sizes = [8, 8], strides = [1, 1]} : vector<8x32xbf16> to vector<8x8xbf16>
    %56 = vector.extract_strided_slice %19 {offsets = [0, 16], sizes = [8, 8], strides = [1, 1]} : vector<8x32xbf16> to vector<8x8xbf16>
    %cst_25 = arith.constant dense<0.000000e+00> : vector<8x8xf32>
    %57 = tpu.matmul %55, %56, %cst_25 {dimension_numbers = #tpu.dot_dimension_numbers<[1], [1], [0], [0], [0, 0, 1, 0], [], []>} : vector<8x8xbf16>, vector<8x8xbf16>, vector<8x8xf32> -> vector<8x8xf32>
    %cst_26 = arith.constant dense<0xFF800000> : vector<8xf32>
    %58 = vector.multi_reduction <maximumf>, %57, %cst_26 [1] : vector<8x8xf32> to vector<8xf32>
    %59 = vector.shape_cast %58 : vector<8xf32> to vector<8x1xf32>
    %60 = vector.broadcast %59 : vector<8x1xf32> to vector<8x8xf32>
    %61 = arith.subf %57, %60 : vector<8x8xf32>
    %62 = math.exp %61 : vector<8x8xf32>
    %cst_27 = arith.constant dense<0.000000e+00> : vector<8xf32>
    %63 = vector.multi_reduction <add>, %62, %cst_27 [1] : vector<8x8xf32> to vector<8xf32>
    %64 = vector.shape_cast %63 : vector<8xf32> to vector<8x1xf32>
    %65 = tpu.reciprocal %64 {approx = true} : vector<8x1xf32> -> vector<8x1xf32>
    %66 = vector.broadcast %65 : vector<8x1xf32> to vector<8x8xf32>
    %67 = arith.mulf %62, %66 : vector<8x8xf32>
    %68 = arith.truncf %67 : vector<8x8xf32> to vector<8x8xbf16>
    %69 = vector.extract_strided_slice %20 {offsets = [0, 16], sizes = [8, 8], strides = [1, 1]} : vector<8x32xbf16> to vector<8x8xbf16>
    %cst_28 = arith.constant dense<0.000000e+00> : vector<8x8xf32>
    %70 = tpu.matmul %68, %69, %cst_28 {dimension_numbers = #tpu.dot_dimension_numbers<[1], [0], [0], [1], [0, 0, 1, 1], [], []>} : vector<8x8xbf16>, vector<8x8xbf16>, vector<8x8xf32> -> vector<8x8xf32>
    %c0_29 = arith.constant 0 : index
    %c16 = arith.constant 16 : index
    %71 = vector.load %arg19[%c0_29, %c16] : memref<8x32xf32, #tpu.memory_space<vmem>>, vector<8x8xf32>
    tpu.vector_store %arg19[%c0_29, %c16], %70 {strides = array<i32>} : memref<8x32xf32, #tpu.memory_space<vmem>>, vector<8x8xf32>,
    %72 = vector.extract_strided_slice %18 {offsets = [0, 24], sizes = [8, 8], strides = [1, 1]} : vector<8x32xbf16> to vector<8x8xbf16>
    %73 = vector.extract_strided_slice %19 {offsets = [0, 24], sizes = [8, 8], strides = [1, 1]} : vector<8x32xbf16> to vector<8x8xbf16>
    %cst_30 = arith.constant dense<0.000000e+00> : vector<8x8xf32>
    %74 = tpu.matmul %72, %73, %cst_30 {dimension_numbers = #tpu.dot_dimension_numbers<[1], [1], [0], [0], [0, 0, 1, 0], [], []>} : vector<8x8xbf16>, vector<8x8xbf16>, vector<8x8xf32> -> vector<8x8xf32>
    %cst_31 = arith.constant dense<0xFF800000> : vector<8xf32>
    %75 = vector.multi_reduction <maximumf>, %74, %cst_31 [1] : vector<8x8xf32> to vector<8xf32>
    %76 = vector.shape_cast %75 : vector<8xf32> to vector<8x1xf32>
    %77 = vector.broadcast %76 : vector<8x1xf32> to vector<8x8xf32>
    %78 = arith.subf %74, %77 : vector<8x8xf32>
    %79 = math.exp %78 : vector<8x8xf32>
    %cst_32 = arith.constant dense<0.000000e+00> : vector<8xf32>
    %80 = vector.multi_reduction <add>, %79, %cst_32 [1] : vector<8x8xf32> to vector<8xf32>
    %81 = vector.shape_cast %80 : vector<8xf32> to vector<8x1xf32>
    %82 = tpu.reciprocal %81 {approx = true} : vector<8x1xf32> -> vector<8x1xf32>
    %83 = vector.broadcast %82 : vector<8x1xf32> to vector<8x8xf32>
    %84 = arith.mulf %79, %83 : vector<8x8xf32>
    %85 = arith.truncf %84 : vector<8x8xf32> to vector<8x8xbf16>
    %86 = vector.extract_strided_slice %20 {offsets = [0, 24], sizes = [8, 8], strides = [1, 1]} : vector<8x32xbf16> to vector<8x8xbf16>
    %cst_33 = arith.constant dense<0.000000e+00> : vector<8x8xf32>
    %87 = tpu.matmul %85, %86, %cst_33 {dimension_numbers = #tpu.dot_dimension_numbers<[1], [0], [0], [1], [0, 0, 1, 1], [], []>} : vector<8x8xbf16>, vector<8x8xbf16>, vector<8x8xf32> -> vector<8x8xf32>
    %c0_34 = arith.constant 0 : index
    %c24 = arith.constant 24 : index
    %88 = vector.load %arg19[%c0_34, %c24] : memref<8x32xf32, #tpu.memory_space<vmem>>, vector<8x8xf32>
    tpu.vector_store %arg19[%c0_34, %c24], %87 {strides = array<i32>} : memref<8x32xf32, #tpu.memory_space<vmem>>, vector<8x8xf32>,
    %c0_35 = arith.constant 0 : index
    %c0_36 = arith.constant 0 : index
    %89 = vector.load %arg19[%c0_35, %c0_36] : memref<8x32xf32, #tpu.memory_space<vmem>>, vector<8x32xf32>
    %90 = arith.truncf %89 : vector<8x32xf32> to vector<8x32xbf16>
    %c0_37 = arith.constant 0 : index
    %c0_38 = arith.constant 0 : index
    %91 = vector.load %arg8[%c0_37, %c0_38] : memref<32x32xbf16, #tpu.memory_space<vmem>>, vector<32x32xbf16>
    %cst_39 = arith.constant dense<0.000000e+00> : vector<8x32xf32>
    %92 = tpu.matmul %90, %91, %cst_39 {dimension_numbers = #tpu.dot_dimension_numbers<[1], [0], [0], [1], [0, 0, 1, 1], [], []>} : vector<8x32xbf16>, vector<32x32xbf16>, vector<8x32xf32> -> vector<8x32xf32>
    %c0_40 = arith.constant 0 : index
    %c0_41 = arith.constant 0 : index
    %93 = vector.load %arg9[%c0_40, %c0_41] : memref<1x32xf32, #tpu.memory_space<vmem>>, vector<1x32xf32>
    %94 = vector.broadcast %93 : vector<1x32xf32> to vector<8x32xf32>
    %95 = arith.addf %92, %94 : vector<8x32xf32>
    %96 = arith.addf %1, %95 : vector<8x32xf32>
    %cst_42 = arith.constant dense<0.000000e+00> : vector<8xf32>
    %97 = vector.multi_reduction <add>, %96, %cst_42 [1] : vector<8x32xf32> to vector<8xf32>
    %98 = vector.shape_cast %97 : vector<8xf32> to vector<8x1xf32>
    %cst_43 = arith.constant 3.200000e+01 : f32
    %99 = vector.broadcast %cst_43 : f32 to vector<8x1xf32>
    %100 = arith.divf %98, %99 : vector<8x1xf32>
    %101 = vector.broadcast %100 : vector<8x1xf32> to vector<8x32xf32>
    %102 = arith.subf %96, %101 : vector<8x32xf32>
    %103 = vector.broadcast %100 : vector<8x1xf32> to vector<8x32xf32>
    %104 = arith.subf %96, %103 : vector<8x32xf32>
    %105 = arith.mulf %102, %104 : vector<8x32xf32>
    %cst_44 = arith.constant dense<0.000000e+00> : vector<8xf32>
    %106 = vector.multi_reduction <add>, %105, %cst_44 [1] : vector<8x32xf32> to vector<8xf32>
    %107 = vector.shape_cast %106 : vector<8xf32> to vector<8x1xf32>
    %cst_45 = arith.constant 3.200000e+01 : f32
    %108 = vector.broadcast %cst_45 : f32 to vector<8x1xf32>
    %109 = arith.divf %107, %108 : vector<8x1xf32>
    %110 = vector.broadcast %100 : vector<8x1xf32> to vector<8x32xf32>
    %111 = arith.subf %96, %110 : vector<8x32xf32>
    %cst_46 = arith.constant 9.99999974E-6 : f32
    %112 = vector.broadcast %cst_46 : f32 to vector<8x1xf32>
    %113 = arith.addf %109, %112 : vector<8x1xf32>
    %114 = math.rsqrt %113 : vector<8x1xf32>
    %115 = vector.broadcast %114 : vector<8x1xf32> to vector<8x32xf32>
    %116 = arith.mulf %111, %115 : vector<8x32xf32>
    %c0_47 = arith.constant 0 : index
    %c0_48 = arith.constant 0 : index
    %117 = vector.load %arg14[%c0_47, %c0_48] : memref<1x32xf32, #tpu.memory_space<vmem>>, vector<1x32xf32>
    %118 = vector.broadcast %117 : vector<1x32xf32> to vector<8x32xf32>
    %119 = arith.mulf %116, %118 : vector<8x32xf32>
    %c0_49 = arith.constant 0 : index
    %c0_50 = arith.constant 0 : index
    %120 = vector.load %arg15[%c0_49, %c0_50] : memref<1x32xf32, #tpu.memory_space<vmem>>, vector<1x32xf32>
    %121 = vector.broadcast %120 : vector<1x32xf32> to vector<8x32xf32>
    %122 = arith.addf %119, %121 : vector<8x32xf32>
    %123 = arith.truncf %122 : vector<8x32xf32> to vector<8x32xbf16>
    %c0_51 = arith.constant 0 : index
    %c0_52 = arith.constant 0 : index
    %124 = vector.load %arg10[%c0_51, %c0_52] : memref<32x64xbf16, #tpu.memory_space<vmem>>, vector<32x64xbf16>
    %cst_53 = arith.constant dense<0.000000e+00> : vector<8x64xf32>
    %125 = tpu.matmul %123, %124, %cst_53 {dimension_numbers = #tpu.dot_dimension_numbers<[1], [0], [0], [1], [0, 0, 1, 1], [], []>} : vector<8x32xbf16>, vector<32x64xbf16>, vector<8x64xf32> -> vector<8x64xf32>
    %c0_54 = arith.constant 0 : index
    %c0_55 = arith.constant 0 : index
    %126 = vector.load %arg11[%c0_54, %c0_55] : memref<1x64xf32, #tpu.memory_space<vmem>>, vector<1x64xf32>
    %127 = vector.broadcast %126 : vector<1x64xf32> to vector<8x64xf32>
    %128 = arith.addf %125, %127 : vector<8x64xf32>
    %129 = arith.truncf %128 : vector<8x64xf32> to vector<8x64xbf16>
    %c0_56 = arith.constant 0 : index
    %c0_57 = arith.constant 0 : index
    %130 = vector.load %arg12[%c0_56, %c0_57] : memref<64x32xbf16, #tpu.memory_space<vmem>>, vector<64x32xbf16>
    %cst_58 = arith.constant dense<0.000000e+00> : vector<8x32xf32>
    %131 = tpu.matmul %129, %130, %cst_58 {dimension_numbers = #tpu.dot_dimension_numbers<[1], [0], [0], [1], [0, 0, 1, 1], [], []>} : vector<8x64xbf16>, vector<64x32xbf16>, vector<8x32xf32> -> vector<8x32xf32>
    %c0_59 = arith.constant 0 : index
    %c0_60 = arith.constant 0 : index
    %132 = vector.load %arg13[%c0_59, %c0_60] : memref<1x32xf32, #tpu.memory_space<vmem>>, vector<1x32xf32>
    %133 = vector.broadcast %132 : vector<1x32xf32> to vector<8x32xf32>
    %134 = arith.addf %131, %133 : vector<8x32xf32>
    %135 = arith.addf %122, %134 : vector<8x32xf32>
    %cst_61 = arith.constant dense<0.000000e+00> : vector<8xf32>
    %136 = vector.multi_reduction <add>, %135, %cst_61 [1] : vector<8x32xf32> to vector<8xf32>
    %137 = vector.shape_cast %136 : vector<8xf32> to vector<8x1xf32>
    %cst_62 = arith.constant 3.200000e+01 : f32
    %138 = vector.broadcast %cst_62 : f32 to vector<8x1xf32>
    %139 = arith.divf %137, %138 : vector<8x1xf32>
    %140 = vector.broadcast %139 : vector<8x1xf32> to vector<8x32xf32>
    %141 = arith.subf %135, %140 : vector<8x32xf32>
    %142 = vector.broadcast %139 : vector<8x1xf32> to vector<8x32xf32>
    %143 = arith.subf %135, %142 : vector<8x32xf32>
    %144 = arith.mulf %141, %143 : vector<8x32xf32>
    %cst_63 = arith.constant dense<0.000000e+00> : vector<8xf32>
    %145 = vector.multi_reduction <add>, %144, %cst_63 [1] : vector<8x32xf32> to vector<8xf32>
    %146 = vector.shape_cast %145 : vector<8xf32> to vector<8x1xf32>
    %cst_64 = arith.constant 3.200000e+01 : f32
    %147 = vector.broadcast %cst_64 : f32 to vector<8x1xf32>
    %148 = arith.divf %146, %147 : vector<8x1xf32>
    %149 = vector.broadcast %139 : vector<8x1xf32> to vector<8x32xf32>
    %150 = arith.subf %135, %149 : vector<8x32xf32>
    %cst_65 = arith.constant 9.99999974E-6 : f32
    %151 = vector.broadcast %cst_65 : f32 to vector<8x1xf32>
    %152 = arith.addf %148, %151 : vector<8x1xf32>
    %153 = math.rsqrt %152 : vector<8x1xf32>
    %154 = vector.broadcast %153 : vector<8x1xf32> to vector<8x32xf32>
    %155 = arith.mulf %150, %154 : vector<8x32xf32>
    %c0_66 = arith.constant 0 : index
    %c0_67 = arith.constant 0 : index
    %156 = vector.load %arg16[%c0_66, %c0_67] : memref<1x32xf32, #tpu.memory_space<vmem>>, vector<1x32xf32>
    %157 = vector.broadcast %156 : vector<1x32xf32> to vector<8x32xf32>
    %158 = arith.mulf %155, %157 : vector<8x32xf32>
    %c0_68 = arith.constant 0 : index
    %c0_69 = arith.constant 0 : index
    %159 = vector.load %arg17[%c0_68, %c0_69] : memref<1x32xf32, #tpu.memory_space<vmem>>, vector<1x32xf32>
    %160 = vector.broadcast %159 : vector<1x32xf32> to vector<8x32xf32>
    %161 = arith.addf %158, %160 : vector<8x32xf32>
    %c0_70 = arith.constant 0 : index
    %c0_71 = arith.constant 0 : index
    %c0_72 = arith.constant 0 : index
    %162 = vector.load %arg18[%c0_70, %c0_71, %c0_72] : memref<1x8x32xf32, #tpu.memory_space<vmem>>, vector<1x8x32xf32>
    %163 = vector.shape_cast %162 : vector<1x8x32xf32> to vector<8x32xf32>
    %164 = vector.shape_cast %161 : vector<8x32xf32> to vector<1x8x32xf32>
    tpu.vector_store %arg18[%c0_70, %c0_71, %c0_72], %164 {strides = array<i32>} : memref<1x8x32xf32, #tpu.memory_space<vmem>>, vector<1x8x32xf32>,
    return
  }
  func.func @transform_0(%arg0: i32, %arg1: i32) -> (i32, i32, i32) {
    %c0_i32 = arith.constant 0 : i32
    %c0_i32_0 = arith.constant 0 : i32
    return %arg0, %arg1, %c0_i32 : i32, i32, i32
  }
  func.func @transform_1(%arg0: i32, %arg1: i32) -> (i32, i32, i32) {
    %c0_i32 = arith.constant 0 : i32
    %c0_i32_0 = arith.constant 0 : i32
    %c0_i32_1 = arith.constant 0 : i32
    return %arg0, %c0_i32, %c0_i32_0 : i32, i32, i32
  }
  func.func @transform_2(%arg0: i32, %arg1: i32) -> (i32, i32) {
    %c0_i32 = arith.constant 0 : i32
    %c0_i32_0 = arith.constant 0 : i32
    %c0_i32_1 = arith.constant 0 : i32
    return %c0_i32, %c0_i32_0 : i32, i32
  }
  func.func @transform_3(%arg0: i32, %arg1: i32) -> (i32, i32) {
    %c0_i32 = arith.constant 0 : i32
    %c0_i32_0 = arith.constant 0 : i32
    %c0_i32_1 = arith.constant 0 : i32
    return %c0_i32, %c0_i32_0 : i32, i32
  }
  func.func @transform_4(%arg0: i32, %arg1: i32) -> (i32, i32) {
    %c0_i32 = arith.constant 0 : i32
    %c0_i32_0 = arith.constant 0 : i32
    %c0_i32_1 = arith.constant 0 : i32
    return %c0_i32, %c0_i32_0 : i32, i32
  }
  func.func @transform_5(%arg0: i32, %arg1: i32) -> (i32, i32) {
    %c0_i32 = arith.constant 0 : i32
    %c0_i32_0 = arith.constant 0 : i32
    %c0_i32_1 = arith.constant 0 : i32
    return %c0_i32, %c0_i32_0 : i32, i32
  }
  func.func @transform_6(%arg0: i32, %arg1: i32) -> (i32, i32) {
    %c0_i32 = arith.constant 0 : i32
    %c0_i32_0 = arith.constant 0 : i32
    %c0_i32_1 = arith.constant 0 : i32
    return %c0_i32, %c0_i32_0 : i32, i32
  }
  func.func @transform_7(%arg0: i32, %arg1: i32) -> (i32, i32) {
    %c0_i32 = arith.constant 0 : i32
    %c0_i32_0 = arith.constant 0 : i32
    %c0_i32_1 = arith.constant 0 : i32
    return %c0_i32, %c0_i32_0 : i32, i32
  }
  func.func @transform_8(%arg0: i32, %arg1: i32) -> (i32, i32) {
    %c0_i32 = arith.constant 0 : i32
    %c0_i32_0 = arith.constant 0 : i32
    %c0_i32_1 = arith.constant 0 : i32
    return %c0_i32, %c0_i32_0 : i32, i32
  }
  func.func @transform_9(%arg0: i32, %arg1: i32) -> (i32, i32) {
    %c0_i32 = arith.constant 0 : i32
    %c0_i32_0 = arith.constant 0 : i32
    %c0_i32_1 = arith.constant 0 : i32
    return %c0_i32, %c0_i32_0 : i32, i32
  }
  func.func @transform_10(%arg0: i32, %arg1: i32) -> (i32, i32) {
    %c0_i32 = arith.constant 0 : i32
    %c0_i32_0 = arith.constant 0 : i32
    %c0_i32_1 = arith.constant 0 : i32
    return %c0_i32, %c0_i32_0 : i32, i32
  }
  func.func @transform_11(%arg0: i32, %arg1: i32) -> (i32, i32) {
    %c0_i32 = arith.constant 0 : i32
    %c0_i32_0 = arith.constant 0 : i32
    %c0_i32_1 = arith.constant 0 : i32
    return %c0_i32, %c0_i32_0 : i32, i32
  }
  func.func @transform_12(%arg0: i32, %arg1: i32) -> (i32, i32) {
    %c0_i32 = arith.constant 0 : i32
    %c0_i32_0 = arith.constant 0 : i32
    %c0_i32_1 = arith.constant 0 : i32
    return %c0_i32, %c0_i32_0 : i32, i32
  }
  func.func @transform_13(%arg0: i32, %arg1: i32) -> (i32, i32) {
    %c0_i32 = arith.constant 0 : i32
    %c0_i32_0 = arith.constant 0 : i32
    %c0_i32_1 = arith.constant 0 : i32
    return %c0_i32, %c0_i32_0 : i32, i32
  }
  func.func @transform_14(%arg0: i32, %arg1: i32) -> (i32, i32) {
    %c0_i32 = arith.constant 0 : i32
    %c0_i32_0 = arith.constant 0 : i32
    %c0_i32_1 = arith.constant 0 : i32
    return %c0_i32, %c0_i32_0 : i32, i32
  }
  func.func @transform_15(%arg0: i32, %arg1: i32) -> (i32, i32) {
    %c0_i32 = arith.constant 0 : i32
    %c0_i32_0 = arith.constant 0 : i32
    %c0_i32_1 = arith.constant 0 : i32
    return %c0_i32, %c0_i32_0 : i32, i32
  }
  func.func @transform_16(%arg0: i32, %arg1: i32) -> (i32, i32, i32) {
    %c0_i32 = arith.constant 0 : i32
    %c0_i32_0 = arith.constant 0 : i32
    return %arg0, %arg1, %c0_i32 : i32, i32, i32
  }
}

</mosaic_0001>

<bundles_post_ra>
// kernel: tpu_custom_call.1
= control target key start
LH: loop header
LB: loop body
LE: loop exit
PB: predicated region body
PF: predicated region fallthrough
CT: control target
= control target key end

     0   :  { %s2546_s0 = inlined_call_operand.vmem [shape: f32[2,8,32], index: 0, kind: input, shape index: {}]   ;;  %s2547_s1 = inlined_call_operand.vmem [shape: f32[2,8,32], index: 1, kind: input, shape index: {}]   ;;  %s2548_s2 = inlined_call_operand.vmem [shape: bf16[32,32], index: 2, kind: input, shape index: {}]   ;;  %s2549_s3 = inlined_call_operand.vmem [shape: f32[1,32], index: 3, kind: input, shape index: {}]   ;;  %s2550_s4 = inlined_call_operand.hbm [shape: bf16[32,64], index: 4, kind: input, shape index: {}]   ;;  %s2551_s5 = inlined_call_operand.vmem [shape: f32[1,64], index: 5, kind: input, shape index: {}]   ;;  %s2552_s6 = inlined_call_operand.hbm [shape: bf16[32,32], index: 6, kind: input, shape index: {}]   ;;  %s2553_s7 = inlined_call_operand.vmem [shape: f32[1,32], index: 7, kind: input, shape index: {}]   ;;  %s2554_s8 = inlined_call_operand.hbm [shape: bf16[32,64], index: 8, kind: input, shape index: {}]   ;;  %s2555_s9 = inlined_call_operand.vmem [shape: f32[1,64], index: 9, kind: input, shape index: {}]   ;;  %s2556_s10 = inlined_call_operand.vmem [shape: bf16[64,32], index: 10, kind: input, shape index: {}]   ;;  %s2557_s11 = inlined_call_operand.vmem [shape: f32[1,32], index: 11, kind: input, shape index: {}]   ;;  %s2558_s12 = inlined_call_operand.vmem [shape: f32[1,32], index: 12, kind: input, shape index: {}]   ;;  %s2559_s13 = inlined_call_operand.vmem [shape: f32[1,32], index: 13, kind: input, shape index: {}]   ;;  %s2560_s14 = inlined_call_operand.vmem [shape: f32[1,32], index: 14, kind: input, shape index: {}]   ;;  %s2561_s15 = inlined_call_operand.vmem [shape: f32[1,32], index: 15, kind: input, shape index: {}]   ;;  %s2562_s16 = inlined_call_operand.hbm [shape: f32[2,8,32], index: 16, kind: output, shape index: {}]  }
   0x1   :  { %2578 = sst [smem:[#allocation22_spill]] %s2546_s0 }
   0x2   :  { %2579 = sst [smem:[#allocation23_spill]] %s2552_s6 }
   0x3   :  { %2580 = sst [smem:[#allocation24_spill]] %s2560_s14 }
   0x4   :  { %2581 = sst [smem:[#allocation25_spill]] %s2561_s15 }
   0x5   :  { %2582 = sst [smem:[#allocation26_spill]] %s2562_s16 }
   0x6   :  { %21 = vsyncpa [#allocation4], 0 }
   0x7   :  { %22 = vsyncpa [#allocation7], 0 }
   0x8   :  { %23 = vsyncpa [#allocation5], 0 }
   0x9   :  { %25 = vsyncpa [#allocation5 + $0x1], 0  ;;  %s2196_s21 = smov 0   ;;  %s2198_s22 = smov 0  }
   0xa   :  { %s2200_s23 = smov 0   ;;  %s2202_s24 = smov 0  }
   0xb   :  { %s2204_s25 = smov 0   ;;  %s2206_s26 = smov 0  }
   0xc LB: > { %2583 = sst [smem:[#allocation13_spill]] %s2071_s21  ;;  %s1612_s27 = sadd.s32 4294967295, %s2091_s26   ;;  %s2091_s26 = sphi %s2206_s26, %s31_s26   ;;  %s2087_s25 = sphi %s2204_s25, %s2617_s25   ;;  %s2083_s24 = sphi %s2202_s24, %s2616_s24   ;;  %s2079_s23 = sphi %s2200_s23, %s2615_s23   ;;  %s2075_s22 = sphi %s2198_s22, %s2614_s22   ;;  %s2071_s21 = sphi %s2196_s21, %s2613_s21  }
   0xd   : > { %2584 = sst [smem:[#allocation14_spill]] %s2075_s22  ;;  %s1613_s28 = sadd.s32 4294967294, %s2091_s26  }
   0xe   : > { %2585 = sst [smem:[#allocation15_spill]] %s2079_s23  ;;  %s43_s29 = sadd.s32 1, %s2087_s25 }
   0xf   : > { %2586 = sst [smem:[#allocation16_spill]] %s2087_s25  ;;  %s400_s30 = sadd.s32 1, %s2079_s23 }
  0x10   : > { %2587 = sst [smem:[#allocation17_spill]] %s2091_s26  ;;  %p45_p0 = scmp.ge.s32.totalorder %s43_s29, 2 }
  0x11   : > { %p410_p1 = scmp.ne.s32.totalorder %s2079_s23, %s2075_s22  ;;  %p411_p2 = scmp.eq.s32.totalorder %s1612_s27, 1 }
  0x12   : > { %p416_p3 = scmp.ne.s32.totalorder %s2075_s22, %s2071_s21  ;;  %s2619_s29 = smov (%p45_p0, %s43_s29), 0 }
  0x13   : > { %2588 = sst [smem:[#allocation18_spill]] %s2619_s29  ;;  %p2236_p4 = por %p411_p2, %p410_p1 }
  0x14   : > { %p417_p5 = scmp.eq.s32.totalorder %s1613_s28, 1  ;;  %s395_s17 = ssub.s32 %s2087_s25, %s2619_s29 }
  0x15   : > { %s2589_s0 = scalar_select %p2236_p4, 1, 0 }
  0x16   : > { %p1614_p6 = scmp.ge.s32.totalorder %s2091_s26, 1  ;;  %p398_p7 = scmp.eq.s32.totalorder %s395_s17, 0 }
  0x17   : > { %2590 = sst [smem:[#allocation19_spill]] %s2589_s0  ;;  %p2243_p8 = por %p417_p5, %p416_p3 }
  0x18   : > { %p424_p9 = scmp.lt.s32.totalorder %s2091_s26, 3  ;;  %p2255_p11 = scmp.eq.s32.totalorder %s1612_s27, 0 }
  0x19   : > { %s2591_s18 = scalar_select %p2243_p8, 1, 0 }
  0x1a   : > { %s2249_s19 = scalar_select %p398_p7, %s2079_s23, %s400_s30  }
  0x1b   : > { %2592 = sst [smem:[#allocation20_spill]] %s2591_s18  ;;  %p2251_p10 = pnand %p1614_p6, %p424_p9 }
  0x1c   : > { %2593 = sst [smem:[#allocation21_spill]] %s2249_s19  ;;  %s2093_s28 = smov [#allocation6]  }
  0x1d   : > { %s2594_s20 = scalar_select %p2251_p10, 1, 0 }
  0x1e   : > { %s2595_s21 = scalar_select %p2255_p11, 1, 0 }
  0x1f   : > { %p1803_p12 = pneg %p2251_p10  ;;  %s458_s17 = sshll.u32 %s2093_s28, 4  ;;  %s459_s17 = int_to_ptr.vmem [resolvable:$true] %s458_s17 }
  0x20   : > { %s2094_s30 = smov [#allocation3]   ;;  %s2597_s6 = sld [smem:[#allocation23_spill]] }
  0x21   : > { %p2263_p13 = pnand %p2255_p11, %p1803_p12  ;;  %s442_s25 = sshll.u32 %s2094_s30, 4  ;;  %s443_s25 = int_to_ptr.vmem [resolvable:$true] %s442_s25 }
  0x23   : > { %p2275_p1 = pneg %p2263_p13 }
  0x26   : > { %s1921_s27 = scalar_lea.hbm %s2597_s6, 256 }
  0x27   : > { %p1922_p0 = scmp.ne.s32.totalorder %s2597_s6, %s1921_s27  ;;  %p1928_p5 = scmp.lt.u32.totalorder %s1921_s27, %s2597_s6 }
  0x29   : > { %p1924_p2 = pnand %p2275_p1, %p1922_p0 }
  0x2b   : > { %p1925_p3 = pneg %p1924_p2 }
  0x2d   : > { %p1930_p6 = pnand %p1928_p5, %p1925_p3 }
  0x2f   : > { %1933 = shalt.err (!%p1930_p6)
}
  0x30   : > { %s1934_s23 = scalar_lea.vmem %s459_s17, 256  ;;  %p1942_p8 = scmp.lt.s32.totalorder %s459_s17, %s459_s17 }
  0x31   : > { %p1935_p7 = scmp.ne.s32.totalorder %s459_s17, %s1934_s23  ;;  %p1943_p4 = scmp.lt.s32.totalorder %s1934_s23, %s1934_s23 }
  0x33   : > { %p1937_p9 = pnand %p1935_p7, %p2275_p1  ;;  %p1944_p11 = por %p1943_p4, %p1942_p8 }
  0x35   : > { %p1938_p12 = pneg %p1937_p9 }
  0x37   : > { %p1945_p10 = pnand %p1944_p11, %p1938_p12 }
  0x39   : > { %1948 = shalt.err (!%p1945_p10)
}
  0x3a   : > { %s2095_s26 = smov 64   ;;  %s2096_s18 = smov 4  }
  0x3b   : > { %1809 = dma.hbm_to_vmem [thread:$0]  (!%p2263_p13), %s2597_s6, 256, %s459_s17, [#allocation7], %s2095_s26, %s2095_s26, %s2096_s18  }
  0x3c   : > { %s1949_s27 = scalar_lea.hbm %s2550_s4, 256 }
  0x3d   : > { %p1950_p4 = scmp.ne.s32.totalorder %s2550_s4, %s1949_s27  ;;  %p1956_p11 = scmp.lt.u32.totalorder %s1949_s27, %s2550_s4 }
  0x3f   : > { %p1952_p8 = pnand %p1950_p4, %p2275_p1 }
  0x41   : > { %p1953_p10 = pneg %p1952_p8 }
  0x43   : > { %p1958_p0 = pnand %p1956_p11, %p1953_p10 }
  0x45   : > { %1961 = shalt.err (!%p1958_p0)
}
  0x46   : > { %s1962_s15 = scalar_lea.vmem %s443_s25, 256  ;;  %p1970_p6 = scmp.lt.s32.totalorder %s443_s25, %s443_s25 }
  0x47   : > { %p1963_p2 = scmp.ne.s32.totalorder %s443_s25, %s1962_s15  ;;  %p1971_p7 = scmp.lt.s32.totalorder %s1962_s15, %s1962_s15 }
  0x49   : > { %p1965_p3 = pnand %p1963_p2, %p2275_p1  ;;  %p1972_p9 = por %p1971_p7, %p1970_p6 }
  0x4b   : > { %p1966_p5 = pneg %p1965_p3 }
  0x4d   : > { %p1973_p12 = pnand %p1972_p9, %p1966_p5 }
  0x4f   : > { %1976 = shalt.err (!%p1973_p12)
}
  0x50   : > { %1806 = dma.hbm_to_vmem [thread:$0]  (!%p2263_p13), %s2550_s4, 256, %s443_s25, [#allocation4], %s2095_s26, %s2095_s26, %s2096_s18  }
  0x51   : > { %s2097_s0 = smov [#allocation8]   ;;  %s1977_s30 = scalar_lea.hbm %s2554_s8, 256 }
  0x52   : > { %s474_s17 = sshll.u32 %s2097_s0, 4  ;;  %p1978_p4 = scmp.ne.s32.totalorder %s2554_s8, %s1977_s30  ;;  %s475_s17 = int_to_ptr.vmem [resolvable:$true] %s474_s17 }
  0x53   : > { %p1984_p11 = scmp.lt.u32.totalorder %s1977_s30, %s2554_s8 }
  0x54   : > { %p1980_p8 = pnand %p1978_p4, %p2275_p1 }
  0x56   : > { %p1981_p10 = pneg %p1980_p8 }
  0x58   : > { %p1986_p0 = pnand %p1984_p11, %p1981_p10 }
  0x5a   : > { %1989 = shalt.err (!%p1986_p0)
}
  0x5b   : > { %s1990_s25 = scalar_lea.vmem %s475_s17, 256  ;;  %p1998_p6 = scmp.lt.s32.totalorder %s475_s17, %s475_s17 }
  0x5c   : > { %p1991_p2 = scmp.ne.s32.totalorder %s475_s17, %s1990_s25  ;;  %p1999_p7 = scmp.lt.s32.totalorder %s1990_s25, %s1990_s25 }
  0x5e   : > { %p1993_p3 = pnand %p1991_p2, %p2275_p1  ;;  %p2000_p9 = por %p1999_p7, %p1998_p6 }
  0x60   : > { %p1994_p5 = pneg %p1993_p3 }
  0x62   : > { %p2001_p12 = pnand %p2000_p9, %p1994_p5 }
  0x64   : > { %2004 = shalt.err (!%p2001_p12)
}
  0x65   : > { %1812 = dma.hbm_to_vmem [thread:$0]  (!%p2263_p13), %s2554_s8, 256, %s475_s17, [#allocation7], %s2095_s26, %s2095_s26, %s2096_s18  }
  0x66   : > { %p2599_p4 = scmp.ne.s32.totalorder %s2594_s20, 0 }
  0x67   : > { %p2600_p1 = scmp.ne.s32.totalorder (!%p2599_p4), %s2595_s21, 0 }
  0x68   : > { %528 = sbr.rel (%p2599_p4) target bundleno = 2651 (0xa5b), region = 84 }
  0x6f   : > { %2058 = dma.done.wait (%p2600_p1), [#allocation4], 256  }
  0x70   : > { %2060 = vsyncadd (%p2600_p1), [#allocation4], 4294967040 }
  0x71   : > { %2062 = dma.done.wait (%p2600_p1), [#allocation7], 512  }
  0x72   : > { %2064 = vsyncadd (%p2600_p1), [#allocation7], 4294966784  ;;  %p592_p8 = scmp.lt.s32.totalorder %s2083_s24, 1  ;;  %v2098_v0 = vmov 0.0   ;;  %vm2099_vm0 = vmmov 0   ;;  %s2601_s26 = sld [smem:[#allocation22_spill]] }
  0x73   : > { %1697 = vmatprep.subr.bf16.mxu1 %v2098_v0  ;;  %1701 = vmatprep.mubr.msk.bf16.mxu1 %vm2099_vm0, %v2098_v0  ;;  %v1889_v1 = vld [vmem:[%s2548_s2] sm:$0xff]   ;;  %v1890_v2 = vld [vmem:[%s2548_s2 + $0x8] sm:$0xff]   ;;  %vm631_vm1 = vcmask 261120   ;;  %v1892_v6 = vld [vmem:[#allocation3 + $0x8] sm:$0xff]   ;;  %vm743_vm2 = vcmask 64512   ;;  %s2100_s14 = smov 112  }
  0x74   : > { %s593_s29 = scalar_select %p592_p8, %s2083_s24, 1  ;;  %1713 = vmatprep.subr.bf16.mxu0 %v2098_v0  ;;  %1715 = vmatprep.mubr.msk.bf16.mxu0 %vm2099_vm0, %v2098_v0  ;;  %v1891_v4 = vld [vmem:[#allocation3] sm:$0xff]   ;;  %v1630_v13 = vld [vmem:[%s2551_s5] ss:$0 sm:$0xff]  ;;  %vm808_vm3 = vcmask 1043456   ;;  %vm968_vm4 = vcmask 130112  }
  0x75   : > { %1698 = vmatpush3.bf16.msra.mxu1 %v1889_v1  ;;  %v1626_v14 = vld [vmem:[%s2549_s3] ss:$0 sm:$0xff]  ;;  %s2103_s28 = smov 96   ;;  %s2104_s21 = smov 80   ;;  %vm1084_vm5 = vcmask 195712   ;;  %vm1200_vm6 = vcmask 261312  }
  0x76   : > { %s1624_s20 = sshll.u32 %s593_s29, 3  ;;  %1699 = vmatprep.subr.bf16.mxu1 %v2098_v0  ;;  %s2101_s29 = smov 120   ;;  %vm1408_vm7 = vcmask 523264  }
  0x77   : > { %s602_s27 = scalar_lea.vmem %s2547_s1, %s1624_s20  ;;  %s2107_s22 = smov 8  }
  0x78   : > { %s598_s18 = scalar_lea.vmem %s2601_s26, %s1624_s20  ;;  %v606_v7 = vld [vmem:[%s602_s27] sm:$0xff]  ;;  %s2102_s20 = smov 104  }
  0x79   : > { %v2363_v3 = vld [vmem:[%s598_s18] sm:$0xff]  ;;  %1700 = vmatpush3.bf16.msra.mxu1 %v1890_v2  ;;  %v607_v8 = vpack.c.bf16 %v606_v7, %v606_v7  ;;  %s2105_s26 = smov 72   ;;  %s2106_s18 = smov 88  }
  0x7a   : > { %v605_v5 = vpack.c.bf16 %v2363_v3, %v2363_v3  ;;  %1705 = vmatprep.subr.bf16.mxu1 %v2098_v0  ;;  %s2108_s0 = smov 16   ;;  %s2109_s17 = smov 24  }
  0x7b   : > { %s2602_s16 = sld [smem:[#allocation14_spill]]  ;;  %s2603_s27 = sld [smem:[#allocation19_spill]] }
  0x7c   : > { %1702 = vmatmul.mubr.msk.bf16.vlgmr.msra.gmra.mrb[0].mxu1 %vm631_vm1, %v605_v5  ;;  %s2604_s25 = sld [smem:[#allocation24_spill]] }
  0x7d   : > { %1706 = vmatpush3.bf16.msra.mxu1 %v1891_v4  ;;  %1709 = vmatprep.mubr.msk.bf16.mxu1 %vm2099_vm0, %v2098_v0 }
  0x7e   : > { %1707 = vmatprep.subr.bf16.mxu1 %v2098_v0 }
  0x81   : > { %1708 = vmatpush3.bf16.msra.mxu1 %v1892_v6  ;;  %s589_s19 = sand.u32 1, %s2602_s16   ;;  %p2608_p10 = scmp.ne.s32.totalorder %s2603_s27, 0 }
  0x82   : > { %1719 = vmatprep.subr.bf16.mxu1 %v2098_v0  ;;  %s1623_s30 = sshll.u32 %s589_s19, 3  ;;  %s1484_s16 = scalar_lea.sflag [#allocation5], %s589_s19 }
  0x84   : > { %1710 = vmatmul.mubr.msk.bf16.vlgmr.msra.gmra.mrb[4].mxu1 %vm631_vm1, %v607_v8 }
  0x85   : > { %1721 = vmatprep.mubr.msk.bf16.mxu1 %vm2099_vm0, %v2098_v0 }
 0x14f   : > { %v669_v9 = vpop.f32.mrb[0].mxu1 }
 0x150   : > { %v1703_v10 = vpop.f32.mrb[1].mxu1  ;;  %v670_v19 = vadd.f32 %v1626_v14, %v669_v9 }
 0x151   : > { %v672_v11 = vpop.f32.mrb[2].mxu1 }
 0x152   : > { %v1704_v12 = vpop.f32.mrb[3].mxu1  ;;  %v741_v23 = vpack.c.bf16 %v670_v19, %v670_v19 }
 0x157   : > { %v735_v15 = vpop.f32.mrb[4].mxu1 }
 0x158   : > { %v736_v16 = vadd.f32 %v1630_v13, %v735_v15  ;;  %v1711_v17 = vpop.f32.mrb[5].mxu1 }
 0x159   : > { %v738_v18 = vpop.f32.mrb[6].mxu1 }
 0x15a   : > { %v2386_v20 = vpack.c.bf16 %v736_v16, %v736_v16  ;;  %v1712_v21 = vpop.f32.mrb[7].mxu1 }
 0x15c   : > { %972 = vrot.lane.b32.xlu1 %v2386_v20, %s2100_s14  ;;  %856 = vrot.lane.b32.xlu0 %v2386_v20, %s2101_s29  ;;  %v748_v22 = vsel %vm743_vm2, %v2386_v20, 0 }
 0x15d   : > { %1714 = vmatpush3.bf16.xpose.msra.mxu0 %v748_v22 }
 0x15e   : > { %1725 = vmatprep.subr.bf16.mxu0 %v2098_v0 }
 0x160   : > { %970 = vrot.lane.b32.xlu1 %v741_v23, %s2100_s14  ;;  %854 = vrot.lane.b32.xlu0 %v741_v23, %s2101_s29  ;;  %s2605_s29 = sld [smem:[#allocation25_spill]] }
 0x164   : > { %1086 = vrot.lane.b32.xlu1 %v741_v23, %s2102_s20  ;;  %1088 = vrot.lane.b32.xlu0 %v2386_v20, %s2102_s20  ;;  %s1661_s20 = sshll.u32 %s2083_s24, 7  ;;  %s2110_s24 = smov [#allocation9]  }
 0x165   : > { %1716 = vmatmul.mubr.msk.bf16.vlgmr.msra.gmra.mrb[0].mxu0 %vm743_vm2, %v741_v23 }
 0x166   : > { %1727 = vmatprep.mubr.msk.bf16.mxu0 %vm2099_vm0, %v2098_v0 }
 0x1ce   : > { %v857_v24 = vpop.permute.xlu0 %856  ;;  %v973_v26 = vpop.permute.xlu1 %972 }
 0x1cf   : > { %v862_v25 = vsel %vm743_vm2, %v857_v24, 0  ;;  %v978_v28 = vsel %vm743_vm2, %v973_v26, 0 }
 0x1d0   : > { %1726 = vmatpush3.bf16.xpose.msra.mxu0 %v862_v25 }
 0x1d1   : > { %1737 = vmatprep.subr.bf16.mxu0 %v2098_v0 }
 0x1d2   : > { %v855_v27 = vpop.permute.xlu0 %854  ;;  %v971_v30 = vpop.permute.xlu1 %970 }
 0x1d6   : > { %v1089_v29 = vpop.permute.xlu0 %1088  ;;  %v1087_v32 = vpop.permute.xlu1 %1086 }
 0x1d7   : > { %1728 = vmatmul.mubr.msk.bf16.vlgmr.msra.gmra.mrb[4].mxu0 %vm743_vm2, %v855_v27  ;;  %v1094_v31 = vsel %vm743_vm2, %v1089_v29, 0 }
 0x1d8   : > { %1738 = vmatpush3.bf16.xpose.msra.mxu0 %v978_v28  ;;  %1739 = vmatprep.mubr.msk.bf16.mxu0 %vm2099_vm0, %v2098_v0 }
 0x1d9   : > { %1749 = vmatprep.subr.bf16.mxu0 %v2098_v0 }
 0x1df   : > { %1740 = vmatmul.mubr.msk.bf16.vlgmr.msra.gmra.mrb[8].mxu0 %vm743_vm2, %v971_v30 }
 0x1e0   : > { %1750 = vmatpush3.bf16.xpose.msra.mxu0 %v1094_v31  ;;  %1751 = vmatprep.mubr.msk.bf16.mxu0 %vm2099_vm0, %v2098_v0 }
 0x1e1   : > { %1761 = vmatprep.subr.bf16.mxu0 %v2098_v0 }
 0x1e7   : > { %1752 = vmatmul.mubr.msk.bf16.vlgmr.msra.gmra.mrb[12].mxu0 %vm743_vm2, %v1087_v32 }
 0x1e8   : > { %1765 = vmatprep.mubr.msk.bf16.mxu0 %vm2099_vm0, %v2098_v0 }
 0x238   : > { %v784_v33 = vpop.f32.mrb[0].mxu0 }
 0x239   : > { %v1717_v34 = vpop.f32.mrb[1].mxu0  ;;  %v790_v35 = vsel %vm743_vm2, %v784_v33, -inf }
 0x23a   : > { %791 = vmax.xlane.f32.xlu0 %v790_v35  ;;  %v787_v36 = vpop.f32.mrb[2].mxu0 }
 0x23b   : > { %v1718_v37 = vpop.f32.mrb[3].mxu0 }
 0x2aa   : > { %v898_v38 = vpop.f32.mrb[4].mxu0 }
 0x2ab   : > { %v1729_v39 = vpop.f32.mrb[5].mxu0  ;;  %v904_v40 = vsel %vm743_vm2, %v898_v38, -inf }
 0x2ac   : > { %905 = vmax.xlane.f32.xlu1 %v904_v40  ;;  %v901_v41 = vpop.f32.mrb[6].mxu0 }
 0x2ad   : > { %v1730_v42 = vpop.f32.mrb[7].mxu0 }
 0x2b2   : > { %v1014_v43 = vpop.f32.mrb[8].mxu0 }
 0x2b3   : > { %v1741_v44 = vpop.f32.mrb[9].mxu0  ;;  %v1020_v45 = vsel %vm743_vm2, %v1014_v43, -inf }
 0x2b4   : > { %1021 = vmax.xlane.f32.xlu0 %v1020_v45  ;;  %v1017_v46 = vpop.f32.mrb[10].mxu0  ;;  %v1894_v44 = vld [vmem:[#allocation6 + $0x8] sm:$0xff]  }
 0x2b5   : > { %v1742_v47 = vpop.f32.mrb[11].mxu0 }
 0x2ba   : > { %v1130_v48 = vpop.f32.mrb[12].mxu0 }
 0x2bb   : > { %v1753_v49 = vpop.f32.mrb[13].mxu0  ;;  %v1136_v50 = vsel %vm743_vm2, %v1130_v48, -inf }
 0x2bc   : > { %1137 = vmax.xlane.f32.xlu0 %v1136_v50  ;;  %v1133_v51 = vpop.f32.mrb[14].mxu0 }
 0x2bd   : > { %v1754_v52 = vpop.f32.mrb[15].mxu0 }
 0x2c7   : > { %v792_v53 = vpop.xlane.xlu0 %791 }
 0x2c8   : > { %v793_v54 = vsub.f32 %v784_v33, %v792_v53 }
 0x2ca   : > { %v794_v55 = vmul.f32 1.442695, %v793_v54 }
 0x2cc   : > { %1901 = vpow2.f32 %v794_v55 }
 0x2d6   : > { %v1902_v56 = vpop.eup %1901 }
 0x2d7   : > { %v796_v57 = vsel %vm743_vm2, %v1902_v56, 0.0 }
 0x2d8   : > { %797 = vadd.xlane.f32.xlu1 %v796_v57 }
 0x2e9   : > { %803 = vrot.lane.b32.xlu1 %v2386_v20, %s2103_s28  ;;  %s591_s28 = scalar_lea.vmem [#allocation9], %s1623_s30  ;;  %s2009_s30 = sshll.u32 %s2110_s24, 4  ;;  %s2010_s30 = int_to_ptr.vmem [resolvable:$false] %s2009_s30 }
 0x2ea   : > { %s2011_s15 = scalar_lea.vmem %s2010_s30, 256 }
 0x339   : > { %v906_v58 = vpop.xlane.xlu1 %905 }
 0x33a   : > { %v907_v59 = vsub.f32 %v898_v38, %v906_v58  ;;  %v1642_v58 = vld [vmem:[%s2553_s7] ss:$0 sm:$0xff] }
 0x33c   : > { %v908_v60 = vmul.f32 1.442695, %v907_v59 }
 0x33e   : > { %1903 = vpow2.f32 %v908_v60 }
 0x341   : > { %v1022_v61 = vpop.xlane.xlu0 %1021 }
 0x342   : > { %v1023_v62 = vsub.f32 %v1014_v43, %v1022_v61  ;;  %v1893_v43 = vld [vmem:[#allocation6] sm:$0xff]  }
 0x343   : > { %1762 = vmatpush3.bf16.msra.mxu0 %v1893_v43 }
 0x344   : > { %v1024_v63 = vmul.f32 1.442695, %v1023_v62  ;;  %1763 = vmatprep.subr.bf16.mxu0 %v2098_v0 }
 0x346   : > { %1905 = vpow2.f32 %v1024_v63 }
 0x347   : > { %1764 = vmatpush3.bf16.msra.mxu0 %v1894_v44 }
 0x348   : > { %v1904_v1 = vpop.eup %1903  ;;  %1777 = vmatprep.subr.bf16.mxu0 %v2098_v0 }
 0x349   : > { %v1138_v2 = vpop.xlane.xlu0 %1137  ;;  %v910_v4 = vsel %vm743_vm2, %v1904_v1, 0.0 }
 0x34a   : > { %v1139_v5 = vsub.f32 %v1130_v48, %v1138_v2  ;;  %911 = vadd.xlane.f32.xlu0 %v910_v4 }
 0x34c   : > { %v1140_v6 = vmul.f32 1.442695, %v1139_v5 }
 0x34e   : > { %1907 = vpow2.f32 %v1140_v6 }
 0x350   : > { %v1906_v7 = vpop.eup %1905 }
 0x351   : > { %v1026_v8 = vsel %vm743_vm2, %v1906_v7, 0.0 }
 0x352   : > { %1027 = vadd.xlane.f32.xlu1 %v1026_v8 }
 0x358   : > { %v1908_v9 = vpop.eup %1907 }
 0x359   : > { %v1142_v10 = vsel %vm743_vm2, %v1908_v9, 0.0 }
 0x35a   : > { %1143 = vadd.xlane.f32.xlu0 %v1142_v10  ;;  %v1896_v10 = vld [vmem:[#allocation8 + $0x8] sm:$0xff]  }
 0x363   : > { %1032 = vrot.lane.b32.xlu1 %v2386_v20, %s2104_s21  ;;  %s1498_s21 = sshll.u32 %s591_s28, 4  ;;  %s2500_s21 = int_to_ptr.vmem [resolvable:$true] %s1498_s21 }
 0x364   : > { %s2005_s23 = scalar_lea.vmem %s2500_s21, 128  ;;  %p2012_p2 = scmp.lt.s32.totalorder %s2500_s21, %s2010_s30 }
 0x365   : > { %v798_v11 = vpop.xlane.xlu1 %797  ;;  %p2006_p13 = scmp.ne.s32.totalorder %s2500_s21, %s2005_s23  ;;  %p2013_p3 = scmp.lt.s32.totalorder %s2011_s15, %s2005_s23 }
 0x366   : > { %1909 = vrcp.f32 %v798_v11  ;;  %v1898_v11 = vld [vmem:[%s2556_s10 + $0x8] sm:$0xff]  }
 0x367   : > { %1148 = vrot.lane.b32.xlu1 %v2386_v20, %s2105_s26  ;;  %p2007_p11 = pnand %p2006_p13, %p2608_p10  ;;  %p2014_p5 = por %p2013_p3, %p2012_p2 }
 0x369   : > { %v804_v12 = vpop.permute.xlu1 %803  ;;  %p2008_p0 = pneg %p2007_p11 }
 0x36a   : > { %v810_v13 = vsel %vm808_vm3, %v804_v12, 0  ;;  %v1899_v12 = vld [vmem:[%s2556_s10 + $0x10] sm:$0xff]  }
 0x36b   : > { %1720 = vmatpush3.bf16.msra.mxu1 %v810_v13  ;;  %p2015_p6 = pnand %p2014_p5, %p2008_p0 }
 0x36c   : > { %1731 = vmatprep.subr.bf16.mxu1 %v2098_v0 }
 0x370   : > { %v1910_v14 = vpop.eup %1909  ;;  %916 = vrot.lane.b32.xlu0 %v2386_v20, %s2106_s18 }
 0x371   : > { %v800_v15 = vmul.f32 %v1910_v14, %v1902_v56 }
 0x373   : > { %v801_v16 = vpack.c.bf16 %v800_v15, %v800_v15 }
 0x375   : > { %1722 = vmatmul.mubr.msk.bf16.vlgmr.msra.gmra.mrb[8].mxu1 %vm743_vm2, %v801_v16 }
 0x376   : > { %1733 = vmatprep.mubr.msk.bf16.mxu1 %vm2099_vm0, %v2098_v0 }
 0x3d7   : > { %v912_v17 = vpop.xlane.xlu0 %911 }
 0x3d8   : > { %1911 = vrcp.f32 %v912_v17  ;;  %v1646_v17 = vld [vmem:[%s2558_s12] ss:$0 sm:$0xff] }
 0x3df   : > { %v1028_v18 = vpop.xlane.xlu1 %1027 }
 0x3e0   : > { %1913 = vrcp.f32 %v1028_v18 }
 0x3e2   : > { %v1912_v19 = vpop.eup %1911 }
 0x3e3   : > { %v914_v22 = vmul.f32 %v1912_v19, %v1904_v1  ;;  %v1033_v25 = vpop.permute.xlu1 %1032  ;;  %v1647_v19 = vld [vmem:[%s2559_s13] ss:$0 sm:$0xff] }
 0x3e4   : > { %v1038_v27 = vsel %vm808_vm3, %v1033_v25, 0 }
 0x3e5   : > { %v915_v20 = vpack.c.bf16 %v914_v22, %v914_v22 }
 0x3e7   : > { %v1144_v21 = vpop.xlane.xlu0 %1143  ;;  %v1149_v29 = vpop.permute.xlu1 %1148 }
 0x3e8   : > { %1915 = vrcp.f32 %v1144_v21  ;;  %v1154_v32 = vsel %vm808_vm3, %v1149_v29, 0 }
 0x3ea   : > { %v1914_v26 = vpop.eup %1913 }
 0x3eb   : > { %v917_v23 = vpop.permute.xlu0 %916  ;;  %v1030_v28 = vmul.f32 %v1914_v26, %v1906_v7 }
 0x3ec   : > { %v922_v24 = vsel %vm808_vm3, %v917_v23, 0 }
 0x3ed   : > { %1732 = vmatpush3.bf16.msra.mxu1 %v922_v24  ;;  %v1031_v30 = vpack.c.bf16 %v1030_v28, %v1030_v28  ;;  %v1648_v24 = vld [vmem:[%s2555_s9] ss:$0 sm:$0xff] }
 0x3ee   : > { %1743 = vmatprep.subr.bf16.mxu1 %v2098_v0 }
 0x3f0   : > { %1734 = vmatmul.mubr.msk.bf16.vlgmr.msra.gmra.mrb[12].mxu1 %vm743_vm2, %v915_v20 }
 0x3f1   : > { %1744 = vmatpush3.bf16.msra.mxu1 %v1038_v27  ;;  %1745 = vmatprep.mubr.msk.bf16.mxu1 %vm2099_vm0, %v2098_v0 }
 0x3f2   : > { %1755 = vmatprep.subr.bf16.mxu1 %v2098_v0  ;;  %v1916_v31 = vpop.eup %1915 }
 0x3f3   : > { %v1146_v33 = vmul.f32 %v1916_v31, %v1908_v9  ;;  %v1895_v9 = vld [vmem:[#allocation8] sm:$0xff]  }
 0x3f5   : > { %v1147_v34 = vpack.c.bf16 %v1146_v33, %v1146_v33 }
 0x3f8   : > { %1746 = vmatmul.mubr.msk.bf16.vlgmr.msra.gmra.mrb[16].mxu1 %vm743_vm2, %v1031_v30  ;;  %v1652_v30 = vld [vmem:[%s2557_s11] ss:$0 sm:$0xff] }
 0x3f9   : > { %1756 = vmatpush3.bf16.msra.mxu1 %v1154_v32  ;;  %1757 = vmatprep.mubr.msk.bf16.mxu1 %vm2099_vm0, %v2098_v0 }
 0x3fa   : > { %1769 = vmatprep.subr.bf16.mxu1 %v2098_v0 }
 0x400   : > { %1758 = vmatmul.mubr.msk.bf16.vlgmr.msra.gmra.mrb[20].mxu1 %vm743_vm2, %v1147_v34 }
 0x401   : > { %1773 = vmatprep.mubr.msk.bf16.mxu1 %vm2099_vm0, %v2098_v0  ;;  %1770 = vmatpush3.bf16.msra.mxu1 %v1895_v9 }
 0x402   : > { %1771 = vmatprep.subr.bf16.mxu1 %v2098_v0 }
 0x405   : > { %1772 = vmatpush3.bf16.msra.mxu1 %v1896_v10 }
 0x448   : > { %v846_v35 = vpop.f32.mrb[8].mxu1 }
 0x449   : > { %852 = vst.msk [vmem:[#allocation2] sm:$0xff] %vm743_vm2, %v846_v35  ;;  %v1723_v36 = vpop.f32.mrb[9].mxu1 }
 0x44a   : > { %v849_v37 = vpop.f32.mrb[10].mxu1 }
 0x44b   : > { %v1724_v38 = vpop.f32.mrb[11].mxu1 }
 0x4c3   : > { %v958_v39 = vpop.f32.mrb[12].mxu1 }
 0x4c4   : > { %965 = vrot.lane.b32.xlu0 %v958_v39, %s2107_s22  ;;  %v1735_v40 = vpop.f32.mrb[13].mxu1  ;;  %s2606_s22 = sld [smem:[#allocation26_spill]] }
 0x4c5   : > { %v961_v41 = vpop.f32.mrb[14].mxu1 }
 0x4c6   : > { %v1736_v42 = vpop.f32.mrb[15].mxu1 }
 0x4cb   : > { %v1074_v45 = vpop.f32.mrb[16].mxu1 }
 0x4cc   : > { %1081 = vrot.lane.b32.xlu1 %v1074_v45, %s2108_s0  ;;  %v1747_v46 = vpop.f32.mrb[17].mxu1  ;;  %s2607_s0 = smov %s2606_s22 }
 0x4cd   : > { %v1077_v47 = vpop.f32.mrb[18].mxu1 }
 0x4ce   : > { %v1748_v48 = vpop.f32.mrb[19].mxu1  ;;  %v1658_v47 = vld [vmem:[%s2604_s25] ss:$0 sm:$0xff] }
 0x4d3   : > { %v1190_v49 = vpop.f32.mrb[20].mxu1 }
 0x4d4   : > { %1197 = vrot.lane.b32.xlu0 %v1190_v49, %s2109_s17  ;;  %v1759_v50 = vpop.f32.mrb[21].mxu1  ;;  %v1659_v49 = vld [vmem:[%s2605_s29] ss:$0 sm:$0xff]  ;;  %s2498_s17 = scalar_lea.hbm %s2606_s22, %s1661_s20 }
 0x4d5   : > { %v1193_v51 = vpop.f32.mrb[22].mxu1 }
 0x4d6   : > { %v1760_v52 = vpop.f32.mrb[23].mxu1 }
 0x536   : > { %v966_v53 = vpop.permute.xlu0 %965 }
 0x537   : > { %969 = vst.msk [vmem:[#allocation2] sm:$0xff] %vm968_vm4, %v966_v53 }
 0x53e   : > { %v1082_v54 = vpop.permute.xlu1 %1081 }
 0x53f   : > { %1085 = vst.msk [vmem:[#allocation2] sm:$0xff] %vm1084_vm5, %v1082_v54 }
 0x546   : > { %v1198_v55 = vpop.permute.xlu0 %1197 }
 0x547   : > { %1201 = vst.msk [vmem:[#allocation2] sm:$0xff] %vm1200_vm6, %v1198_v55 }
 0x54e   : > { %v1202_v56 = vld [vmem:[#allocation2] sm:$0xff] }
 0x54f   : > { %v1203_v57 = vpack.c.bf16 %v1202_v56, %v1202_v56 }
 0x551   : > { %1766 = vmatmul.mubr.msk.bf16.vlgmr.msra.gmra.mrb[16].mxu0 %vm631_vm1, %v1203_v57 }
 0x552   : > { %1785 = vmatprep.mubr.msk.bf16.mxu0 %vm2099_vm0, %v2098_v0 }
 0x624   : > { %v1264_v59 = vpop.f32.mrb[16].mxu0 }
 0x625   : > { %v1265_v60 = vadd.f32 %v1642_v58, %v1264_v59  ;;  %v1767_v61 = vpop.f32.mrb[17].mxu0 }
 0x626   : > { %v1267_v62 = vpop.f32.mrb[18].mxu0 }
 0x627   : > { %v1768_v63 = vpop.f32.mrb[19].mxu0  ;;  %v1270_v1 = vadd.f32 %v1265_v60, %v2363_v3  ;;  %v1897_v3 = vld [vmem:[%s2556_s10] sm:$0xff]  }
 0x628   : > { %1778 = vmatpush3.bf16.msra.mxu0 %v1897_v3 }
 0x629   : > { %v1271_v2 = vsel %vm631_vm1, %v1270_v1, 0.0  ;;  %1779 = vmatprep.subr.bf16.mxu0 %v2098_v0 }
 0x62a   : > { %1272 = vadd.xlane.f32.xlu1 %v1271_v2 }
 0x62c   : > { %1780 = vmatpush3.bf16.msra.mxu0 %v1898_v11 }
 0x62d   : > { %1781 = vmatprep.subr.bf16.mxu0 %v2098_v0 }
 0x630   : > { %1782 = vmatpush3.bf16.msra.mxu0 %v1899_v12 }
 0x631   : > { %1783 = vmatprep.subr.bf16.mxu0 %v2098_v0  ;;  %v1900_v0 = vld [vmem:[%s2556_s10 + $0x18] sm:$0xff]  }
 0x634   : > { %1784 = vmatpush3.bf16.msra.mxu0 %v1900_v0 }
 0x6b7   : > { %v1273_v4 = vpop.xlane.xlu1 %1272 }
 0x6b8   : > { %v1275_v5 = vmul.f32 0.03125, %v1273_v4 }
 0x6ba   : > { %v1276_v6 = vsub.f32 %v1270_v1, %v1275_v5 }
 0x6bc   : > { %v1277_v7 = vmul.f32 %v1276_v6, %v1276_v6 }
 0x6be   : > { %v1278_v8 = vsel %vm631_vm1, %v1277_v7, 0.0 }
 0x6bf   : > { %1279 = vadd.xlane.f32.xlu0 %v1278_v8 }
 0x74c   : > { %v1280_v13 = vpop.xlane.xlu0 %1279 }
 0x74d   : > { %v1281_v14 = vmul.f32 0.03125, %v1280_v13 }
 0x74f   : > { %v1282_v15 = vadd.f32 1e-05, %v1281_v14 }
 0x751   : > { %1917 = vrsqrt.f32 %v1282_v15 }
 0x75b   : > { %v1918_v16 = vpop.eup %1917 }
 0x75c   : > { %v1284_v18 = vmul.f32 %v1918_v16, %v1276_v6 }
 0x75e   : > { %v1292_v21 = vmul.f32 %v1646_v17, %v1284_v18 }
 0x760   : > { %v1300_v22 = vadd.f32 %v1647_v19, %v1292_v21 }
 0x762   : > { %v1301_v23 = vpack.c.bf16 %v1300_v22, %v1300_v22 }
 0x764   : > { %1774 = vmatmul.mubr.msk.bf16.vlgmr.msra.gmra.mrb[24].mxu1 %vm631_vm1, %v1301_v23 }
 0x837   : > { %v1362_v25 = vpop.f32.mrb[24].mxu1 }
 0x838   : > { %v1363_v20 = vadd.f32 %v1648_v24, %v1362_v25  ;;  %v1775_v26 = vpop.f32.mrb[25].mxu1 }
 0x839   : > { %v1365_v27 = vpop.f32.mrb[26].mxu1 }
 0x83a   : > { %v1368_v28 = vpack.c.bf16 %v1363_v20, %v1363_v20  ;;  %v1776_v29 = vpop.f32.mrb[27].mxu1 }
 0x83c   : > { %1786 = vmatmul.mubr.msk.bf16.vlgmr.msra.gmra.mrb[20].mxu0 %vm1408_vm7, %v1368_v28 }
 0x90f   : > { %v1446_v31 = vpop.f32.mrb[20].mxu0 }
 0x910   : > { %v1447_v32 = vadd.f32 %v1652_v30, %v1446_v31  ;;  %v1787_v33 = vpop.f32.mrb[21].mxu0 }
 0x911   : > { %v1449_v34 = vpop.f32.mrb[22].mxu0 }
 0x912   : > { %v1788_v35 = vpop.f32.mrb[23].mxu0  ;;  %v1452_v36 = vadd.f32 %v1447_v32, %v1300_v22 }
 0x914   : > { %v1453_v37 = vsel %vm631_vm1, %v1452_v36, 0.0 }
 0x915   : > { %1454 = vadd.xlane.f32.xlu0 %v1453_v37 }
 0x9a2   : > { %v1455_v38 = vpop.xlane.xlu0 %1454 }
 0x9a3   : > { %v1456_v39 = vmul.f32 0.03125, %v1455_v38 }
 0x9a5   : > { %v1457_v40 = vsub.f32 %v1452_v36, %v1456_v39 }
 0x9a7   : > { %v1458_v41 = vmul.f32 %v1457_v40, %v1457_v40 }
 0x9a9   : > { %v1459_v42 = vsel %vm631_vm1, %v1458_v41, 0.0 }
 0x9aa   : > { %1460 = vadd.xlane.f32.xlu1 %v1459_v42 }
 0xa37   : > { %v1461_v43 = vpop.xlane.xlu1 %1460 }
 0xa38   : > { %v1462_v44 = vmul.f32 0.03125, %v1461_v43 }
 0xa3a   : > { %v1463_v45 = vadd.f32 1e-05, %v1462_v44 }
 0xa3c   : > { %1919 = vrsqrt.f32 %v1463_v45 }
 0xa46   : > { %v1920_v46 = vpop.eup %1919 }
 0xa47   : > { %v1465_v48 = vmul.f32 %v1920_v46, %v1457_v40 }
 0xa49   : > { %v1473_v50 = vmul.f32 %v1658_v47, %v1465_v48 }
 0xa4b   : > { %v1481_v51 = vadd.f32 %v1659_v49, %v1473_v50 }
 0xa4d   : > { %1482 = vst.msk [vmem:[%s591_s28] sm:$0xff] %vm631_vm1, %v1481_v51 }
 0xa4e   : > { %2018 = shalt.err (!%p2015_p6)
}
 0xa4f   : > { %s2019_s19 = scalar_lea.hbm %s2498_s17, 128  ;;  %s2023_s14 = scalar_lea.hbm %s2607_s0, 256 }
 0xa50   : > { %p2020_p7 = scmp.ne.s32.totalorder %s2498_s17, %s2019_s19  ;;  %p2024_p4 = scmp.lt.u32.totalorder %s2498_s17, %s2607_s0 }
 0xa51   : > { %p2025_p1 = scmp.lt.u32.totalorder %s2023_s14, %s2019_s19  ;;  %p2027_p13 = scmp.lt.u32.totalorder %s2019_s19, %s2498_s17 }
 0xa52   : > { %p2021_p9 = pnand %p2020_p7, %p2608_p10 }
 0xa53   : > { %p2026_p8 = por %p2025_p1, %p2024_p4 }
 0xa54   : > { %p2022_p12 = pneg %p2021_p9 }
 0xa55   : > { %p2028_p11 = por %p2027_p13, %p2026_p8 }
 0xa57   : > { %p2029_p0 = pnand %p2028_p11, %p2022_p12 }
 0xa59   : > { %2032 = shalt.err (!%p2029_p0)
}
 0xa5a   : > { %1801 = dma.vmem_to_hbm [thread:$0]  (%p2608_p10), %s2500_s21, 128, %s2498_s17, %s1484_s16  }
 0xa5b PF: > { %s2609_s28 = sld [smem:[#allocation17_spill]]  ;;  %s2610_s26 = sld [smem:[#allocation13_spill]] }
 0xa5c   : > { %s2611_s18 = sld [smem:[#allocation20_spill]] }
 0xa61   : > { %p1823_p2 = scmp.ge.s32.totalorder %s2609_s28, 2  ;;  %s1510_s22 = sand.u32 1, %s2610_s26  }
 0xa62   : > { %p2612_p3 = scmp.ne.s32.totalorder %s2611_s18, 0  ;;  %s1511_s23 = scalar_lea.sflag [#allocation5], %s1510_s22 }
 0xa64   : > { %p1814_p5 = pnand %p1823_p2, %p2612_p3 }
 0xa66   : > { %2066 = dma.done.wait (!%p1814_p5), %s1511_s23, 128  }
 0xa67   : > { %2068 = vsyncadd (!%p1814_p5), %s1511_s23, 4294967168  ;;  %s31_s26 = sadd.s32 1, %s2609_s28   ;;  %s2613_s21 = sld [smem:[#allocation14_spill]] }
 0xa68   : > { %p28_p6 = scmp.ge.s32.totalorder %s31_s26, 4   ;;  %s2614_s22 = sld [smem:[#allocation15_spill]] }
 0xa69   : > { %s2615_s23 = sld [smem:[#allocation21_spill]]  ;;  %s2616_s24 = sld [smem:[#allocation16_spill]] }
 0xa6a   : > { %s2617_s25 = sld [smem:[#allocation18_spill]]  ;;  %30 = sbr.rel (!%p28_p6) target bundleno = 12 (0xc), region = 135 }
 0xa71   :  { %1516 = vsyncpa [#allocation4], 1 }
 0xa72   :  { %1518 = vsyncpa [#allocation4 + $0x1], 1 }
 0xa73   :  { %1519 = vsyncpa [#allocation7], 1 }
 0xa74   :  { %1520 = vsyncpa [#allocation5], 1 }
 0xa75   :  { %1522 = vsyncpa [#allocation5 + $0x1], 1 }

</bundles_post_ra>
